<compile_context>
chip_gen: v6e
topology: v6e:2x2x1
jax: 0.10.0
libtpu: 0.0.40
codegen_flags: <defaults>
</compile_context>

<pallas_src>
import functools

import jax
import jax.numpy as jnp
from jax.experimental import pallas as pl
from jax.experimental.pallas import tpu as pltpu


# --------------------------------------------------------------------------- #
# Kernel
# --------------------------------------------------------------------------- #
def _upsample_block_kernel(rep_ref, x_ref, o_ref, *, s, compute_dtype, precision):
    """rep_ref: (TW, TW*s) 0/1 matrix (resident),
       x_ref:   (TB, TH_in, TW),
       o_ref:   (TB, TH_in*s, TW*s)   -- nearest-neighbor upsample by s."""
    rep = rep_ref[...]                              # (TW, TW*s), stays in VMEM
    tb, th_in, tw = x_ref.shape
    ow_t = tw * s

    for b in range(tb):                             # small static channel loop
        x_in = x_ref[b]                             # (TH_in, TW) in input dtype
        x = x_in.astype(compute_dtype)
        # ---- W replication along lanes on the MXU:  y[:, k] = x[:, k // s] --
        y = jnp.dot(x, rep,
                    preferred_element_type=jnp.float32,
                    precision=precision)
        y = y.astype(x_in.dtype)                    # (TH_in, TW*s)
        # ---- H replication along sublanes: out row r = y row r // s ---------
        z = jnp.broadcast_to(y[:, None, :], (th_in, s, ow_t)).reshape(th_in * s, ow_t)
        o_ref[b] = z


# --------------------------------------------------------------------------- #
# Tiling / config helpers
# --------------------------------------------------------------------------- #
def _sublane_multiple(itemsize):
    # f32 -> 8, bf16 -> 16, int8/fp8 -> 32 (packed-row alignment).
    return max(8, 32 // int(itemsize))


def _largest_divisor_leq(n, limit, multiple_of=1):
    """Largest d with d | n, d <= limit, d % multiple_of == 0 (or None)."""
    limit = min(int(limit), int(n))
    limit = (limit // multiple_of) * multiple_of
    for cand in range(limit, 0, -multiple_of):
        if n % cand == 0:
            return cand
    return None


def _matmul_config(dtype):
    """Compute dtype + MXU precision that keep the 0/1 replication exact."""
    if dtype == jnp.bfloat16:
        # 0/1 weights are exact in bf16; f32 accumulation -> exact copy.
        return jnp.bfloat16, jax.lax.Precision.DEFAULT
    # f32 (and anything upcast to f32) needs the multi-pass path to be exact.
    return jnp.float32, jax.lax.Precision.HIGHEST


def _replication_matrix(tw, s, dtype):
    """rep[j, k] = 1 iff k // s == j  (so  y[:, k] = x[:, k // s])."""
    src = jax.lax.broadcasted_iota(jnp.int32, (tw, tw * s), 0)
    dst = jax.lax.broadcasted_iota(jnp.int32, (tw, tw * s), 1)
    return (dst // s == src).astype(dtype)


def _pick_tiles(nc, h, w, s, itemsize, target_out_block_bytes=2 * 1024 * 1024):
    """Pick (TB channels, TH_in rows, TW cols) per grid step.

    Targets ~2 MiB of output per step (safe within v7x's 64 MiB VMEM while
    still at the HBM roofline), keeps the sublane block dtype-aligned, and
    leaves the leading grid extent >= 2 for megacore sharding.
    """
    sub = _sublane_multiple(itemsize)

    # ---- lane tile (TW): 256 maps cleanly on v6e/v7x 256x256 MXUs and as
    # clean 2x passes on v5e's 128x128 MXUs.
    tw_max = 256
    if w <= tw_max:
        tw = w
    else:
        # TODO(synk): a cdiv grid with a padded partial lane tile would avoid
        # this full-W fallback for widths with no 128-multiple divisor.
        tw = _largest_divisor_leq(w, tw_max, multiple_of=128) or w

    # ---- row tile (TH_in), sized against the *output* block (s^2 x larger).
    out_bytes_per_in_row = tw * s * s * itemsize
    max_rows = max(1, target_out_block_bytes // max(1, out_bytes_per_in_row))
    if max_rows >= h:
        th_in = h
    else:
        th_in = (_largest_divisor_leq(h, max_rows, multiple_of=sub)
                 or _largest_divisor_leq(h, max_rows, multiple_of=8)
                 or h)

    # ---- channel block (TB): amortize per-step overhead on small maps.
    out_block_bytes_per_c = th_in * s * tw * s * itemsize
    max_tb = max(1, target_out_block_bytes // max(1, out_block_bytes_per_c))
    max_tb = min(max_tb, 16)                 # bound static unrolling in-kernel
    if nc >= 2:
        max_tb = min(max_tb, nc // 2)        # keep >= 2 steps for v7x dual-TC
    max_tb = max(max_tb, 1)
    tb = _largest_divisor_leq(nc, max_tb) or 1

    return tb, th_in, tw


# --------------------------------------------------------------------------- #
# Wrapper
# --------------------------------------------------------------------------- #
def upsample_nearest(x_nchw, scale_factor):
    """Equivalent of F.interpolate(x, scale_factor=s, mode='nearest'), NCHW,
    integer scale factor."""
    s = int(round(float(scale_factor)))
    assert float(scale_factor) == float(s) and s >= 1, "integer scale only"
    n, c, h, w = x_nchw.shape
    if s == 1:
        return x_nchw
    oh, ow = h * s, w * s
    dtype = x_nchw.dtype
    itemsize = jnp.dtype(dtype).itemsize
    compute_dtype, precision = _matmul_config(dtype)

    nc = n * c
    x3 = x_nchw.reshape(nc, h, w)            # free contiguous reshape (W = lanes)

    tb, th_in, tw = _pick_tiles(nc, h, w, s, itemsize)
    th_out = th_in * s
    grid = (nc // tb, h // th_in, w // tw)

    # Hoisted 0/1 replication matrix: constant index_map -> resident in VMEM.
    rep = _replication_matrix(tw, s, compute_dtype)

    # NOTE: when OW < 128 (tiny maps) output stores are lane-sparse; this is
    # correct but below roofline — acceptable for small feature maps.
    out3 = pl.pallas_call(
        functools.partial(_upsample_block_kernel, s=s,
                          compute_dtype=compute_dtype, precision=precision),
        out_shape=jax.ShapeDtypeStruct((nc, oh, ow), dtype),
        grid_spec=pltpu.PrefetchScalarGridSpec(
            num_scalar_prefetch=0,
            grid=grid,
            in_specs=[
                # replication matrix: same block every step -> no re-DMA
                pl.BlockSpec((tw, tw * s), lambda b, r, j: (0, 0)),
                # input: 1:1 block mapping with the output -> each byte read once
                pl.BlockSpec((tb, th_in, tw), lambda b, r, j: (b, r, j)),
            ],
            out_specs=pl.BlockSpec((tb, th_out, tw * s), lambda b, r, j: (b, r, j)),
        ),
        compiler_params=pltpu.CompilerParams(
            dimension_semantics=("parallel", "parallel", "parallel"),
            vmem_limit_bytes=32 * 1024 * 1024,
        ),
    )(rep, x3)

    return out3.reshape(n, c, oh, ow)        # free contiguous split


class Upsample:
    """JAX/Pallas port of esrgan_model_arch.Upsample (nearest, integer scale)."""

    def __init__(self, size=None, scale_factor=None, mode='nearest', align_corners=None):
        assert mode == 'nearest' and size is None and align_corners is None, \
            "only mode='nearest' with scale_factor is ported"
        if isinstance(scale_factor, tuple):
            assert len(set(float(f) for f in scale_factor)) == 1
            scale_factor = scale_factor[0]
        self.scale_factor = float(scale_factor)
        self.mode = mode

    def __call__(self, x):
        return upsample_nearest(x, self.scale_factor)


if __name__ == "__main__":
    key = jax.random.PRNGKey(0)
    # minibatch x channels x height x width, like the PyTorch module
    x = jax.random.normal(key, (2, 4, 16, 16), dtype=jnp.float32)

    up = Upsample(scale_factor=2, mode='nearest')
    y = jax.block_until_ready(up(x))

    # pure-JAX reference: nearest 2x upsample == repeat each pixel along H and W
    ref = jnp.repeat(jnp.repeat(x, 2, axis=2), 2, axis=3)

    assert y.shape == (2, 4, 32, 32), y.shape
    assert y.dtype == x.dtype
    assert jnp.array_equal(y, ref), "mismatch vs nearest-neighbor reference"

    # quick bf16 path check (DEFAULT-precision bf16 matmul must still be exact)
    xb = x.astype(jnp.bfloat16)
    yb = jax.block_until_ready(up(xb))
    refb = jnp.repeat(jnp.repeat(xb, 2, axis=2), 2, axis=3)
    assert jnp.array_equal(yb, refb), "bf16 mismatch vs reference"

    print("KERNEL_OK")
</pallas_src>

<mosaic_0001>
module attributes {stable_mosaic.version = 11 : i64} {
  func.func @_upsample_block_kernel(%arg0: i32, %arg1: i32, %arg2: i32, %arg3: memref<16x32xf32, #tpu.memory_space<vmem>>, %arg4: memref<4x16x16xf32, #tpu.memory_space<vmem>>, %arg5: memref<4x32x32xf32, #tpu.memory_space<vmem>>) attributes {dimension_semantics = [#tpu.dimension_semantics<parallel>, #tpu.dimension_semantics<parallel>, #tpu.dimension_semantics<parallel>], iteration_bounds = array<i64: 2, 1, 1>, scalar_prefetch = 0 : i64, scratch_operands = 0 : i64, tpu.core_type = #tpu.core_type<tc>, window_params = [{pipeline_mode = #tpu.pipeline_mode<synchronous>, transform_indices = @transform_0, window_bounds = array<i64: 16, 32>}, {transform_indices = @transform_1, window_bounds = array<i64: 4, 16, 16>}, {transform_indices = @transform_2, window_bounds = array<i64: 4, 32, 32>}]} {
    %c0 = arith.constant 0 : index
    %c0_0 = arith.constant 0 : index
    %0 = vector.load %arg3[%c0, %c0_0] : memref<16x32xf32, #tpu.memory_space<vmem>>, vector<16x32xf32>
    %c0_1 = arith.constant 0 : index
    %c0_2 = arith.constant 0 : index
    %c0_3 = arith.constant 0 : index
    %1 = vector.load %arg4[%c0_1, %c0_2, %c0_3] : memref<4x16x16xf32, #tpu.memory_space<vmem>>, vector<1x16x16xf32>
    %2 = vector.shape_cast %1 : vector<1x16x16xf32> to vector<16x16xf32>
    %cst = arith.constant dense<0.000000e+00> : vector<16x32xf32>
    %3 = tpu.matmul %2, %0, %cst {dimension_numbers = #tpu.dot_dimension_numbers<[1], [0], [0], [1], [0, 0, 1, 1], [], []>, precision = #tpu.contract_precision<fp32>} : vector<16x16xf32>, vector<16x32xf32>, vector<16x32xf32> -> vector<16x32xf32>
    %4 = vector.shape_cast %3 : vector<16x32xf32> to vector<16x1x32xf32>
    %5 = vector.shape_cast %4 : vector<16x1x32xf32> to vector<16x1x32xf32>
    %6 = vector.broadcast %5 : vector<16x1x32xf32> to vector<16x2x32xf32>
    %7 = vector.shape_cast %6 : vector<16x2x32xf32> to vector<32x32xf32>
    %c0_4 = arith.constant 0 : index
    %c0_5 = arith.constant 0 : index
    %c0_6 = arith.constant 0 : index
    %8 = vector.load %arg5[%c0_4, %c0_5, %c0_6] : memref<4x32x32xf32, #tpu.memory_space<vmem>>, vector<1x32x32xf32>
    %9 = vector.shape_cast %8 : vector<1x32x32xf32> to vector<32x32xf32>
    %10 = vector.shape_cast %7 : vector<32x32xf32> to vector<1x32x32xf32>
    tpu.vector_store %arg5[%c0_4, %c0_5, %c0_6], %10 {strides = array<i32>} : memref<4x32x32xf32, #tpu.memory_space<vmem>>, vector<1x32x32xf32>,
    %c1 = arith.constant 1 : index
    %c0_7 = arith.constant 0 : index
    %c0_8 = arith.constant 0 : index
    %11 = vector.load %arg4[%c1, %c0_7, %c0_8] : memref<4x16x16xf32, #tpu.memory_space<vmem>>, vector<1x16x16xf32>
    %12 = vector.shape_cast %11 : vector<1x16x16xf32> to vector<16x16xf32>
    %cst_9 = arith.constant dense<0.000000e+00> : vector<16x32xf32>
    %13 = tpu.matmul %12, %0, %cst_9 {dimension_numbers = #tpu.dot_dimension_numbers<[1], [0], [0], [1], [0, 0, 1, 1], [], []>, precision = #tpu.contract_precision<fp32>} : vector<16x16xf32>, vector<16x32xf32>, vector<16x32xf32> -> vector<16x32xf32>
    %14 = vector.shape_cast %13 : vector<16x32xf32> to vector<16x1x32xf32>
    %15 = vector.shape_cast %14 : vector<16x1x32xf32> to vector<16x1x32xf32>
    %16 = vector.broadcast %15 : vector<16x1x32xf32> to vector<16x2x32xf32>
    %17 = vector.shape_cast %16 : vector<16x2x32xf32> to vector<32x32xf32>
    %c1_10 = arith.constant 1 : index
    %c0_11 = arith.constant 0 : index
    %c0_12 = arith.constant 0 : index
    %18 = vector.load %arg5[%c1_10, %c0_11, %c0_12] : memref<4x32x32xf32, #tpu.memory_space<vmem>>, vector<1x32x32xf32>
    %19 = vector.shape_cast %18 : vector<1x32x32xf32> to vector<32x32xf32>
    %20 = vector.shape_cast %17 : vector<32x32xf32> to vector<1x32x32xf32>
    tpu.vector_store %arg5[%c1_10, %c0_11, %c0_12], %20 {strides = array<i32>} : memref<4x32x32xf32, #tpu.memory_space<vmem>>, vector<1x32x32xf32>,
    %c2 = arith.constant 2 : index
    %c0_13 = arith.constant 0 : index
    %c0_14 = arith.constant 0 : index
    %21 = vector.load %arg4[%c2, %c0_13, %c0_14] : memref<4x16x16xf32, #tpu.memory_space<vmem>>, vector<1x16x16xf32>
    %22 = vector.shape_cast %21 : vector<1x16x16xf32> to vector<16x16xf32>
    %cst_15 = arith.constant dense<0.000000e+00> : vector<16x32xf32>
    %23 = tpu.matmul %22, %0, %cst_15 {dimension_numbers = #tpu.dot_dimension_numbers<[1], [0], [0], [1], [0, 0, 1, 1], [], []>, precision = #tpu.contract_precision<fp32>} : vector<16x16xf32>, vector<16x32xf32>, vector<16x32xf32> -> vector<16x32xf32>
    %24 = vector.shape_cast %23 : vector<16x32xf32> to vector<16x1x32xf32>
    %25 = vector.shape_cast %24 : vector<16x1x32xf32> to vector<16x1x32xf32>
    %26 = vector.broadcast %25 : vector<16x1x32xf32> to vector<16x2x32xf32>
    %27 = vector.shape_cast %26 : vector<16x2x32xf32> to vector<32x32xf32>
    %c2_16 = arith.constant 2 : index
    %c0_17 = arith.constant 0 : index
    %c0_18 = arith.constant 0 : index
    %28 = vector.load %arg5[%c2_16, %c0_17, %c0_18] : memref<4x32x32xf32, #tpu.memory_space<vmem>>, vector<1x32x32xf32>
    %29 = vector.shape_cast %28 : vector<1x32x32xf32> to vector<32x32xf32>
    %30 = vector.shape_cast %27 : vector<32x32xf32> to vector<1x32x32xf32>
    tpu.vector_store %arg5[%c2_16, %c0_17, %c0_18], %30 {strides = array<i32>} : memref<4x32x32xf32, #tpu.memory_space<vmem>>, vector<1x32x32xf32>,
    %c3 = arith.constant 3 : index
    %c0_19 = arith.constant 0 : index
    %c0_20 = arith.constant 0 : index
    %31 = vector.load %arg4[%c3, %c0_19, %c0_20] : memref<4x16x16xf32, #tpu.memory_space<vmem>>, vector<1x16x16xf32>
    %32 = vector.shape_cast %31 : vector<1x16x16xf32> to vector<16x16xf32>
    %cst_21 = arith.constant dense<0.000000e+00> : vector<16x32xf32>
    %33 = tpu.matmul %32, %0, %cst_21 {dimension_numbers = #tpu.dot_dimension_numbers<[1], [0], [0], [1], [0, 0, 1, 1], [], []>, precision = #tpu.contract_precision<fp32>} : vector<16x16xf32>, vector<16x32xf32>, vector<16x32xf32> -> vector<16x32xf32>
    %34 = vector.shape_cast %33 : vector<16x32xf32> to vector<16x1x32xf32>
    %35 = vector.shape_cast %34 : vector<16x1x32xf32> to vector<16x1x32xf32>
    %36 = vector.broadcast %35 : vector<16x1x32xf32> to vector<16x2x32xf32>
    %37 = vector.shape_cast %36 : vector<16x2x32xf32> to vector<32x32xf32>
    %c3_22 = arith.constant 3 : index
    %c0_23 = arith.constant 0 : index
    %c0_24 = arith.constant 0 : index
    %38 = vector.load %arg5[%c3_22, %c0_23, %c0_24] : memref<4x32x32xf32, #tpu.memory_space<vmem>>, vector<1x32x32xf32>
    %39 = vector.shape_cast %38 : vector<1x32x32xf32> to vector<32x32xf32>
    %40 = vector.shape_cast %37 : vector<32x32xf32> to vector<1x32x32xf32>
    tpu.vector_store %arg5[%c3_22, %c0_23, %c0_24], %40 {strides = array<i32>} : memref<4x32x32xf32, #tpu.memory_space<vmem>>, vector<1x32x32xf32>,
    return
  }
  func.func @transform_0(%arg0: i32, %arg1: i32, %arg2: i32) -> (i32, i32) {
    %c0_i32 = arith.constant 0 : i32
    %c0_i32_0 = arith.constant 0 : i32
    %c0_i32_1 = arith.constant 0 : i32
    return %c0_i32, %c0_i32_0 : i32, i32
  }
  func.func @transform_1(%arg0: i32, %arg1: i32, %arg2: i32) -> (i32, i32, i32) {
    %c0_i32 = arith.constant 0 : i32
    return %arg0, %arg1, %arg2 : i32, i32, i32
  }
  func.func @transform_2(%arg0: i32, %arg1: i32, %arg2: i32) -> (i32, i32, i32) {
    %c0_i32 = arith.constant 0 : i32
    return %arg0, %arg1, %arg2 : i32, i32, i32
  }
}

</mosaic_0001>

<bundles_post_ra>
// kernel: tpu_custom_call.1
= control target key start
LH: loop header
LB: loop body
LE: loop exit
PB: predicated region body
PF: predicated region fallthrough
CT: control target
= control target key end

     0   :  { %7 = vsyncpa [#allocation3], 0  ;;  %s4477_s0 = inlined_call_operand.hbm [shape: f32[16,32], index: 0, kind: input, shape index: {}]   ;;  %s4478_s1 = inlined_call_operand.hbm [shape: f32[8,16,16], index: 1, kind: input, shape index: {}]   ;;  %s4479_s2 = inlined_call_operand.hbm [shape: f32[8,32,32], index: 2, kind: output, shape index: {}]  }
   0x1   :  { %8 = vsyncpa [#allocation6], 0 }
   0x2   :  { %10 = vsyncpa [#allocation6 + $0x1], 0 }
   0x3   :  { %11 = vsyncpa [#allocation4], 0 }
   0x4   :  { %13 = vsyncpa [#allocation4 + $0x1], 0  ;;  %s3892_s9 = smov 0   ;;  %s3894_s10 = smov 0  }
   0x5   :  { %s3896_s11 = smov 0   ;;  %s3898_s12 = smov 0  }
   0x6   :  { %s3900_s13 = smov 0   ;;  %s3902_s14 = smov 0  }
   0x7 LB: > { %s3344_s15 = sadd.s32 4294967295, %s3866_s14   ;;  %s3345_s16 = sadd.s32 4294967294, %s3866_s14   ;;  %s3866_s14 = sphi %s3902_s14, %s19_s14   ;;  %s3862_s13 = sphi %s3900_s13, %s4499_s13   ;;  %s3858_s12 = sphi %s3898_s12, %s4498_s12   ;;  %s3854_s11 = sphi %s3896_s11, %s4497_s11   ;;  %s3850_s10 = sphi %s3894_s10, %s4496_s10   ;;  %s3846_s9 = sphi %s3892_s9, %s4495_s9  }
   0x8   : > { %p83_p0 = scmp.ne.s32.totalorder %s3850_s10, %s3846_s9  ;;  %p3926_p1 = scmp.eq.s32.totalorder %s3344_s15, 0 }
   0x9   : > { %p3930_p2 = scmp.eq.s32.totalorder %s3344_s15, 1  ;;  %p117_p3 = scmp.eq.s32.totalorder %s3345_s16, 1 }
   0xa   : > { %p3936_p4 = por %p3926_p1, %p83_p0  ;;  %p3346_p5 = scmp.ge.s32.totalorder %s3866_s14, 1 }
   0xb   : > { %p3941_p6 = por %p117_p3, %p83_p0  ;;  %p124_p7 = scmp.lt.s32.totalorder %s3866_s14, 3 }
   0xc   : > { %s4484_s19 = scalar_select %p3936_p4, 1, 0 }
   0xd   : > { %s4485_s20 = scalar_select %p3941_p6, 1, 0 }
   0xe   : > { %p3946_p8 = pnand %p3346_p5, %p124_p7  ;;  %s3868_s22 = smov [#allocation2]  }
   0xf   : > { %s136_s23 = sshll.u32 %s3868_s22, 4  ;;  %s38_s25 = sadd.s32 1, %s3862_s13  ;;  %s137_s23 = int_to_ptr.vmem [resolvable:$true] %s136_s23 }
  0x10   : > { %p3657_p9 = pneg %p3946_p8  ;;  %s3739_s26 = scalar_lea.vmem %s137_s23, 256 }
  0x11   : > { %p3740_p13 = scmp.ne.s32.totalorder %s137_s23, %s3739_s26  ;;  %p3747_p5 = scmp.lt.s32.totalorder %s137_s23, %s137_s23 }
  0x12   : > { %p3955_p11 = pnand %p3657_p9, %p3926_p1  ;;  %p3748_p7 = scmp.lt.s32.totalorder %s3739_s26, %s3739_s26 }
  0x14   : > { %p3730_p12 = pneg %p3955_p11  ;;  %p3749_p6 = por %p3748_p7, %p3747_p5 }
  0x16   : > { %p3742_p0 = pnand %p3740_p13, %p3730_p12 }
  0x18   : > { %p3743_p3 = pneg %p3742_p0 }
  0x1a   : > { %p3750_p4 = pnand %p3749_p6, %p3743_p3 }
  0x1c   : > { %3753 = shalt.err (!%p3750_p4)
}
  0x1d   : > { %s4481_s27 = smov 128   ;;  %s3870_s28 = smov 8  }
  0x1e   : > { %3660 = dma.hbm_to_vmem [thread:$0]  (!%p3955_p11), %s4477_s0, 256, %s137_s23, [#allocation3], %s4481_s27, %s4481_s27, %s3870_s28  }
  0x1f   : > { %p40_p4 = scmp.ge.s32.totalorder %s38_s25, 2  ;;  %s70_s3 = sadd.s32 1, %s3854_s11 }
  0x20   : > { %p77_p6 = scmp.ne.s32.totalorder %s3854_s11, %s3850_s10  ;;  %p78_p9 = scmp.eq.s32.totalorder %s3866_s14, 0 }
  0x21   : > { %s4501_s25 = smov (%p40_p4, %s38_s25), 0  ;;  %p3670_p0 = scmp.lt.s32.totalorder %s3866_s14, 2 }
  0x22   : > { %p3976_p12 = por %p78_p9, %p77_p6  ;;  %p3982_p13 = por %p3930_p2, %p77_p6 }
  0x23   : > { %s63_s6 = ssub.s32 %s3862_s13, %s4501_s25  ;;  %s150_s7 = sand.u32 1, %s3854_s11  }
  0x24   : > { %p68_p11 = scmp.eq.s32.totalorder %s63_s6, 0  ;;  %s3349_s8 = sshll.u32 %s150_s7, 6 }
  0x25   : > { %s3382_s16 = sshll.u32 %s3862_s13, 10  ;;  %s154_s26 = scalar_lea.vmem [#allocation5], %s3349_s8 }
  0x26   : > { %s3991_s15 = scalar_select %p68_p11, %s3854_s11, %s70_s3  }
  0x27   : > { %s164_s24 = scalar_lea.hbm %s4478_s1, %s3382_s16  ;;  %s165_s29 = sshll.u32 %s154_s26, 4  ;;  %s166_s29 = int_to_ptr.vmem [resolvable:$true] %s165_s29 }
  0x28   : > { %p3999_p2 = pnand %p3670_p0, %p3976_p12  ;;  %s151_s30 = scalar_lea.sflag [#allocation6], %s150_s7 }
  0x29   : > { %s3767_s6 = scalar_lea.vmem %s166_s29, 1024  ;;  %s3871_s3 = smov [#allocation5]  }
  0x2a   : > { %p3756_p3 = pneg %p3999_p2  ;;  %p3768_p5 = scmp.ne.s32.totalorder %s166_s29, %s3767_s6 }
  0x2b   : > { %s3772_s27 = sshll.u32 %s3871_s3, 4  ;;  %s3773_s27 = int_to_ptr.vmem [resolvable:$false] %s3772_s27 }
  0x2c   : > { %p3770_p7 = pnand %p3768_p5, %p3756_p3  ;;  %s3774_s16 = scalar_lea.vmem %s3773_s27, 2048 }
  0x2d   : > { %p3775_p6 = scmp.lt.s32.totalorder %s166_s29, %s3773_s27  ;;  %p3776_p9 = scmp.lt.s32.totalorder %s3774_s16, %s3767_s6 }
  0x2e   : > { %p3771_p4 = pneg %p3770_p7 }
  0x2f   : > { %p3777_p11 = por %p3776_p9, %p3775_p6 }
  0x31   : > { %p3778_p10 = pnand %p3777_p11, %p3771_p4 }
  0x33   : > { %3781 = shalt.err (!%p3778_p10)
}
  0x34   : > { %s4491_s4 = smov 128   ;;  %177 = sbr.rel (%p3946_p8) target bundleno = 382 (0x17e), region = 28 }
  0x35   : > { %3664 = dma.hbm_to_vmem [thread:$0]  (!%p3999_p2), %s164_s24, 1024, %s166_s29, %s151_s30, %s4491_s4, %s4491_s4, %s3870_s28  }
  0x39   : > { %3833 = dma.done.wait (%p3926_p1), [#allocation3], 256  }
  0x3a   : > { %3835 = vsyncadd (%p3926_p1), [#allocation3], 4294967040  ;;  %s4017_s27 = sand.u32 1, %s3850_s10   ;;  %p4492_p10 = scmp.ne.s32.totalorder %s4484_s19, 0 }
  0x3b   : > { %s3355_s7 = sshll.u32 %s4017_s27, 6  ;;  %s184_s8 = scalar_lea.sflag [#allocation6], %s4017_s27 }
  0x3c   : > { %s4021_s22 = scalar_lea.vmem [#allocation5], %s3355_s7 }
  0x3d   : > { %3837 = dma.done.wait (%p4492_p10), %s184_s8, 1024  }
  0x3e   : > { %3839 = vsyncadd (%p4492_p10), %s184_s8, 4294966272  ;;  %vm216_vm0 = vcmask 130048   ;;  %v213_v0 = vld [vmem:[#allocation2 + $0x8] sm:$0xff]  ;;  %v212_v1 = vld [vmem:[#allocation2] sm:$0xff]  ;;  %vm961_vm1 = vcmask 261120   ;;  %s3356_s17 = sshll.u32 %s4017_s27, 7 }
  0x3f   : > { %v214_v2 = vld [vmem:[%s4021_s22] sm:$0xff]  ;;  %v4028_v3 = vand.u32 4294901760, %v213_v0  ;;  %v4030_v4 = vand.u32 4294901760, %v212_v1  ;;  %v215_v6 = vld [vmem:[%s4021_s22 + $0x8] sm:$0xff]  ;;  %v3357_v12 = vld [vmem:[%s4021_s22 + $0x10] sm:$0xff]  ;;  %s4275_s19 = scalar_lea.vmem [#allocation7], %s3356_s17 }
  0x40   : > { %v218_v5 = vsel %vm216_vm0, %v214_v2, 0  ;;  %v221_v8 = vsel %vm216_vm0, %v215_v6, 0  ;;  %v3358_v14 = vld [vmem:[%s4021_s22 + $0x18] sm:$0xff]  ;;  %v970_v19 = vsel %vm216_vm0, %v3357_v12, 0  ;;  %v3363_v37 = vld [vmem:[%s4021_s22 + $0x20] sm:$0xff]  ;;  %v3364_v39 = vld [vmem:[%s4021_s22 + $0x28] sm:$0xff] }
  0x41   : > { %v4034_v7 = vand.u32 4294901760, %v218_v5  ;;  %3481 = vmatprep.subr.mxu0 %v4028_v3  ;;  %v4039_v9 = vsub.f32 %v213_v0, %v4028_v3  ;;  %v4041_v10 = vand.u32 4294901760, %v221_v8  ;;  %v4044_v11 = vsub.f32 %v212_v1, %v4030_v4  ;;  %v3369_v51 = vld [vmem:[%s4021_s22 + $0x30] sm:$0xff]  ;;  %v3370_v53 = vld [vmem:[%s4021_s22 + $0x38] sm:$0xff]  ;;  %s3384_s21 = sshll.u32 %s3858_s12, 11  ;;  %s3240_s28 = sshll.u32 %s4275_s19, 4  ;;  %s4425_s28 = int_to_ptr.vmem [resolvable:$true] %s3240_s28 }
  0x42   : > { %3482 = vmatpush3.msra.mxu0 %v4028_v3  ;;  %v973_v23 = vsel %vm216_vm0, %v3358_v14, 0  ;;  %v4071_v28 = vand.u32 4294901760, %v970_v19  ;;  %v1722_v40 = vsel %vm216_vm0, %v3363_v37, 0  ;;  %v1725_v42 = vsel %vm216_vm0, %v3364_v39, 0  ;;  %s4423_s12 = scalar_lea.hbm %s4479_s2, %s3384_s21  ;;  %s3223_s26 = scalar_lea.sflag [#allocation4], %s4017_s27 }
  0x43   : > { %v291_v13 = vsub.f32 %v218_v5, %v4034_v7  ;;  %3492 = vmatprep.mubr.f32.mxu1 %v4034_v7  ;;  %3483 = vmatprep.subr.mxu0 %v4030_v4  ;;  %v4053_v15 = vand.u32 4294901760, %v4039_v9  ;;  %v301_v16 = vsub.f32 %v221_v8, %v4041_v10  ;;  %v4057_v17 = vand.u32 4294901760, %v4044_v11  ;;  %s3782_s29 = scalar_lea.vmem %s4425_s28, 2048  ;;  %s3874_s18 = smov [#allocation7]  }
  0x44   : > { %3484 = vmatpush3.msra.mxu0 %v4030_v4  ;;  %v4073_v30 = vand.u32 4294901760, %v973_v23  ;;  %v4079_v32 = vsub.f32 %v970_v19, %v4071_v28  ;;  %v4116_v44 = vand.u32 4294901760, %v1722_v40  ;;  %v4120_v45 = vand.u32 4294901760, %v1725_v42  ;;  %p3783_p1 = scmp.ne.s32.totalorder %s4425_s28, %s3782_s29  ;;  %s3786_s30 = sshll.u32 %s3874_s18, 4  ;;  %s3787_s30 = int_to_ptr.vmem [resolvable:$false] %s3786_s30 }
  0x45   : > { %v292_v18 = vand.u32 4294901760, %v291_v13  ;;  %v342_v20 = vsub.f32 %v4039_v9, %v4053_v15  ;;  %v302_v21 = vand.u32 4294901760, %v301_v16  ;;  %v349_v22 = vsub.f32 %v4044_v11, %v4057_v17  ;;  %3495 = vmatprep.subr.mxu0 %v4039_v9  ;;  %s3788_s6 = scalar_lea.vmem %s3787_s30, 4096  ;;  %p3789_p0 = scmp.lt.s32.totalorder %s4425_s28, %s3787_s30 }
  0x46   : > { %v4084_v33 = vsub.f32 %v973_v23, %v4073_v30  ;;  %v1044_v34 = vand.u32 4294901760, %v4079_v32  ;;  %v4127_v46 = vsub.f32 %v1722_v40, %v4116_v44  ;;  %v4132_v47 = vsub.f32 %v1725_v42, %v4120_v45  ;;  %p3784_p8 = pnand %p3783_p1, %p3982_p13  ;;  %p3790_p2 = scmp.lt.s32.totalorder %s3788_s6, %s3782_s29 }
  0x47   : > { %v293_v24 = vsub.f32 %v291_v13, %v292_v18  ;;  %v4067_v25 = vand.u32 4294901760, %v342_v20  ;;  %v303_v26 = vsub.f32 %v301_v16, %v302_v21  ;;  %v4069_v27 = vand.u32 4294901760, %v349_v22 }
  0x48   : > { %v1054_v35 = vand.u32 4294901760, %v4084_v33  ;;  %v1045_v36 = vsub.f32 %v4079_v32, %v1044_v34  ;;  %v1796_v48 = vand.u32 4294901760, %v4127_v46  ;;  %v1806_v49 = vand.u32 4294901760, %v4132_v47  ;;  %p3785_p12 = pneg %p3784_p8  ;;  %p3791_p3 = por %p3790_p2, %p3789_p0 }
  0x49   : > { %v294_v29 = vand.u32 4294901760, %v293_v24  ;;  %3488 = vmatprep.subr.mxu1 %v4067_v25  ;;  %v304_v31 = vand.u32 4294901760, %v303_v26  ;;  %v2474_v54 = vsel %vm216_vm0, %v3369_v51, 0  ;;  %v2477_v56 = vsel %vm216_vm0, %v3370_v53, 0 }
  0x4a   : > { %3489 = vmatpush3.msra.mxu1 %v4067_v25  ;;  %v1055_v38 = vsub.f32 %v4084_v33, %v1054_v35  ;;  %v1046_v41 = vand.u32 4294901760, %v1045_v36  ;;  %v1797_v50 = vsub.f32 %v4127_v46, %v1796_v48  ;;  %v1807_v52 = vsub.f32 %v4132_v47, %v1806_v49  ;;  %p3792_p5 = pnand %p3791_p3, %p3785_p12 }
  0x4b   : > { %3485 = vmatprep.mubr.f32.mxu0 %v294_v29  ;;  %3490 = vmatprep.subr.mxu1 %v4069_v27  ;;  %v4166_v58 = vand.u32 4294901760, %v2474_v54  ;;  %v4170_v59 = vand.u32 4294901760, %v2477_v56 }
  0x4c   : > { %3486 = vmatmul.mubr.f32.vlgmr.msra.gmra.mxu0 %v304_v31  ;;  %3491 = vmatpush3.msra.mxu1 %v4069_v27  ;;  %v1056_v43 = vand.u32 4294901760, %v1055_v38  ;;  %v1798_v55 = vand.u32 4294901760, %v1797_v50  ;;  %v1808_v57 = vand.u32 4294901760, %v1807_v52 }
  0x4d   : > { %3496 = vmatpush3.msra.mxu0 %v4039_v9  ;;  %3493 = vmatmul.mubr.f32.vlgmr.msra.gmra.mxu1 %v4041_v10  ;;  %v2547_v60 = vsub.f32 %v2474_v54, %v4166_v58  ;;  %v2557_v61 = vsub.f32 %v2477_v56, %v4170_v59 }
  0x4e   : > { %3497 = vmatprep.subr.mxu0 %v4044_v11  ;;  %3502 = vmatprep.subr.mxu1 %v4028_v3 }
  0x4f   : > { %3498 = vmatpush3.msra.mxu0 %v4044_v11  ;;  %3499 = vmatprep.mubr.f32.mxu0 %v291_v13  ;;  %v2548_v62 = vand.u32 4294901760, %v2547_v60  ;;  %v2558_v63 = vand.u32 4294901760, %v2557_v61  ;;  %v3872_v13 = vmov 1966171168  }
  0x50   : > { %3503 = vmatpush3.msra.mxu1 %v4028_v3  ;;  %3500 = vmatmul.mubr.f32.vlgmr.msra.gmra.mxu0 %v301_v16  ;;  %v729_v14 = vunpack.c.l.s4 %v3872_v13 }
  0x51   : > { %3504 = vmatprep.subr.mxu1 %v4030_v4  ;;  %3509 = vmatprep.subr.mxu0 %v4053_v15  ;;  %v2549_v0 = vsub.f32 %v2547_v60, %v2548_v62  ;;  %v2559_v1 = vsub.f32 %v2557_v61, %v2558_v63 }
  0x52   : > { %3505 = vmatpush3.msra.mxu1 %v4030_v4  ;;  %3506 = vmatprep.mubr.f32.mxu1 %v292_v18 }
  0x53   : > { %3510 = vmatpush3.msra.mxu0 %v4053_v15  ;;  %3507 = vmatmul.mubr.f32.vlgmr.msra.gmra.mxu1 %v302_v21  ;;  %v2550_v2 = vand.u32 4294901760, %v2549_v0  ;;  %v2560_v5 = vand.u32 4294901760, %v2559_v1 }
  0x54   : > { %3511 = vmatprep.subr.mxu0 %v4057_v17  ;;  %3516 = vmatprep.subr.mxu1 %v4028_v3 }
  0x55   : > { %3512 = vmatpush3.msra.mxu0 %v4057_v17  ;;  %3513 = vmatprep.mubr.f32.mxu0 %v4034_v7 }
  0x56   : > { %3517 = vmatpush3.msra.mxu1 %v4028_v3  ;;  %3514 = vmatmul.mubr.f32.vlgmr.msra.gmra.mxu0 %v4041_v10 }
  0x57   : > { %3518 = vmatprep.subr.mxu1 %v4030_v4  ;;  %3523 = vmatprep.subr.mxu0 %v4028_v3 }
  0x58   : > { %3519 = vmatpush3.msra.mxu1 %v4030_v4  ;;  %3520 = vmatprep.mubr.f32.mxu1 %v4034_v7 }
  0x59   : > { %3524 = vmatpush3.msra.mxu0 %v4028_v3  ;;  %3521 = vmatmul.mubr.f32.vlgmr.msra.gmra.mxu1 %v4041_v10 }
  0x5a   : > { %3525 = vmatprep.subr.mxu0 %v4030_v4  ;;  %3530 = vmatprep.subr.mxu1 %v4067_v25 }
  0x5b   : > { %3526 = vmatpush3.msra.mxu0 %v4030_v4  ;;  %3527 = vmatprep.mubr.f32.mxu0 %v1046_v41 }
  0x5c   : > { %3531 = vmatpush3.msra.mxu1 %v4067_v25  ;;  %3528 = vmatmul.mubr.f32.vlgmr.msra.gmra.mxu0 %v1056_v43 }
  0x5d   : > { %3532 = vmatprep.subr.mxu1 %v4069_v27  ;;  %3537 = vmatprep.subr.mxu0 %v4039_v9 }
  0x5e   : > { %3533 = vmatpush3.msra.mxu1 %v4069_v27  ;;  %3534 = vmatprep.mubr.f32.mxu1 %v4071_v28 }
  0x5f   : > { %3538 = vmatpush3.msra.mxu0 %v4039_v9  ;;  %3535 = vmatmul.mubr.f32.vlgmr.msra.gmra.mxu1 %v4073_v30 }
  0x60   : > { %3539 = vmatprep.subr.mxu0 %v4044_v11  ;;  %3544 = vmatprep.subr.mxu1 %v4028_v3 }
  0x61   : > { %3540 = vmatpush3.msra.mxu0 %v4044_v11  ;;  %3541 = vmatprep.mubr.f32.mxu0 %v4079_v32 }
  0x62   : > { %3545 = vmatpush3.msra.mxu1 %v4028_v3  ;;  %3542 = vmatmul.mubr.f32.vlgmr.msra.gmra.mxu0 %v4084_v33 }
  0x63   : > { %3546 = vmatprep.subr.mxu1 %v4030_v4  ;;  %3551 = vmatprep.subr.mxu0 %v4053_v15 }
  0x64   : > { %3547 = vmatpush3.msra.mxu1 %v4030_v4  ;;  %3548 = vmatprep.mubr.f32.mxu1 %v1044_v34 }
  0x65   : > { %3552 = vmatpush3.msra.mxu0 %v4053_v15  ;;  %3549 = vmatmul.mubr.f32.vlgmr.msra.gmra.mxu1 %v1054_v35 }
  0x66   : > { %3553 = vmatprep.subr.mxu0 %v4057_v17  ;;  %3558 = vmatprep.subr.mxu1 %v4028_v3 }
  0x67   : > { %3554 = vmatpush3.msra.mxu0 %v4057_v17  ;;  %3555 = vmatprep.mubr.f32.mxu0 %v4071_v28 }
  0x68   : > { %3559 = vmatpush3.msra.mxu1 %v4028_v3  ;;  %3556 = vmatmul.mubr.f32.vlgmr.msra.gmra.mxu0 %v4073_v30 }
  0x69   : > { %3560 = vmatprep.subr.mxu1 %v4030_v4  ;;  %3565 = vmatprep.subr.mxu0 %v4028_v3 }
  0x6a   : > { %3561 = vmatpush3.msra.mxu1 %v4030_v4  ;;  %3562 = vmatprep.mubr.f32.mxu1 %v4071_v28 }
  0x6b   : > { %3566 = vmatpush3.msra.mxu0 %v4028_v3  ;;  %3563 = vmatmul.mubr.f32.vlgmr.msra.gmra.mxu1 %v4073_v30 }
  0x6c   : > { %3567 = vmatprep.subr.mxu0 %v4030_v4  ;;  %3572 = vmatprep.subr.mxu1 %v4067_v25 }
  0x6d   : > { %3568 = vmatpush3.msra.mxu0 %v4030_v4  ;;  %3569 = vmatprep.mubr.f32.mxu0 %v1798_v55 }
  0x6e   : > { %3573 = vmatpush3.msra.mxu1 %v4067_v25  ;;  %3570 = vmatmul.mubr.f32.vlgmr.msra.gmra.mxu0 %v1808_v57 }
  0x6f   : > { %3574 = vmatprep.subr.mxu1 %v4069_v27  ;;  %3579 = vmatprep.subr.mxu0 %v4039_v9 }
  0x70   : > { %3575 = vmatpush3.msra.mxu1 %v4069_v27  ;;  %3576 = vmatprep.mubr.f32.mxu1 %v4116_v44 }
  0x71   : > { %3580 = vmatpush3.msra.mxu0 %v4039_v9  ;;  %3577 = vmatmul.mubr.f32.vlgmr.msra.gmra.mxu1 %v4120_v45 }
  0x72   : > { %3581 = vmatprep.subr.mxu0 %v4044_v11  ;;  %3586 = vmatprep.subr.mxu1 %v4028_v3 }
  0x73   : > { %3582 = vmatpush3.msra.mxu0 %v4044_v11  ;;  %3583 = vmatprep.mubr.f32.mxu0 %v4127_v46 }
  0x74   : > { %3587 = vmatpush3.msra.mxu1 %v4028_v3  ;;  %3584 = vmatmul.mubr.f32.vlgmr.msra.gmra.mxu0 %v4132_v47 }
  0x75   : > { %3588 = vmatprep.subr.mxu1 %v4030_v4  ;;  %3593 = vmatprep.subr.mxu0 %v4053_v15 }
  0x76   : > { %3589 = vmatpush3.msra.mxu1 %v4030_v4  ;;  %3590 = vmatprep.mubr.f32.mxu1 %v1796_v48 }
  0x77   : > { %3594 = vmatpush3.msra.mxu0 %v4053_v15  ;;  %3591 = vmatmul.mubr.f32.vlgmr.msra.gmra.mxu1 %v1806_v49 }
  0x78   : > { %3595 = vmatprep.subr.mxu0 %v4057_v17  ;;  %3600 = vmatprep.subr.mxu1 %v4028_v3 }
  0x79   : > { %3596 = vmatpush3.msra.mxu0 %v4057_v17  ;;  %3597 = vmatprep.mubr.f32.mxu0 %v4116_v44 }
  0x7a   : > { %3601 = vmatpush3.msra.mxu1 %v4028_v3  ;;  %3598 = vmatmul.mubr.f32.vlgmr.msra.gmra.mxu0 %v4120_v45 }
  0x7b   : > { %3602 = vmatprep.subr.mxu1 %v4030_v4  ;;  %3607 = vmatprep.subr.mxu0 %v4028_v3 }
  0x7c   : > { %3603 = vmatpush3.msra.mxu1 %v4030_v4  ;;  %3604 = vmatprep.mubr.f32.mxu1 %v4116_v44 }
  0x7d   : > { %3608 = vmatpush3.msra.mxu0 %v4028_v3  ;;  %3605 = vmatmul.mubr.f32.vlgmr.msra.gmra.mxu1 %v4120_v45 }
  0x7e   : > { %3609 = vmatprep.subr.mxu0 %v4030_v4  ;;  %3614 = vmatprep.subr.mxu1 %v4067_v25 }
  0x7f   : > { %3610 = vmatpush3.msra.mxu0 %v4030_v4  ;;  %3611 = vmatprep.mubr.f32.mxu0 %v2550_v2 }
  0x80   : > { %3615 = vmatpush3.msra.mxu1 %v4067_v25  ;;  %3612 = vmatmul.mubr.f32.vlgmr.msra.gmra.mxu0 %v2560_v5  ;;  %v3873_v25 = vmov 1983009808  }
  0x81   : > { %3616 = vmatprep.subr.mxu1 %v4069_v27  ;;  %3621 = vmatprep.subr.mxu0 %v4039_v9  ;;  %v892_v26 = vunpack.c.l.s4 %v3873_v25 }
  0x82   : > { %3617 = vmatpush3.msra.mxu1 %v4069_v27  ;;  %3618 = vmatprep.mubr.f32.mxu1 %v4166_v58 }
  0x83   : > { %3622 = vmatpush3.msra.mxu0 %v4039_v9  ;;  %3619 = vmatmul.mubr.f32.vlgmr.msra.gmra.mxu1 %v4170_v59  ;;  %v893_v32 = vunpack.c.0.s8 %v892_v26 }
  0x84   : > { %3623 = vmatprep.subr.mxu0 %v4044_v11  ;;  %3628 = vmatprep.subr.mxu1 %v4028_v3 }
  0x85   : > { %3624 = vmatpush3.msra.mxu0 %v4044_v11  ;;  %3625 = vmatprep.mubr.f32.mxu0 %v2547_v60 }
  0x86   : > { %3629 = vmatpush3.msra.mxu1 %v4028_v3  ;;  %3626 = vmatmul.mubr.f32.vlgmr.msra.gmra.mxu0 %v2557_v61 }
  0x87   : > { %3630 = vmatprep.subr.mxu1 %v4030_v4  ;;  %3635 = vmatprep.subr.mxu0 %v4053_v15 }
  0x88   : > { %3631 = vmatpush3.msra.mxu1 %v4030_v4  ;;  %3632 = vmatprep.mubr.f32.mxu1 %v2548_v62 }
  0x89   : > { %3636 = vmatpush3.msra.mxu0 %v4053_v15  ;;  %3633 = vmatmul.mubr.f32.vlgmr.msra.gmra.mxu1 %v2558_v63 }
  0x8a   : > { %3637 = vmatprep.subr.mxu0 %v4057_v17  ;;  %3642 = vmatprep.subr.mxu1 %v4028_v3 }
  0x8b   : > { %3638 = vmatpush3.msra.mxu0 %v4057_v17  ;;  %3639 = vmatprep.mubr.f32.mxu0 %v4166_v58 }
  0x8c   : > { %3643 = vmatpush3.msra.mxu1 %v4028_v3  ;;  %3640 = vmatmul.mubr.f32.vlgmr.msra.gmra.mxu0 %v4170_v59  ;;  %v731_v3 = vlaneseq }
  0x8d   : > { %3644 = vmatprep.subr.mxu1 %v4030_v4  ;;  %3646 = vmatprep.mubr.f32.mxu1 %v4166_v58 }
  0x8e   : > { %3645 = vmatpush3.msra.mxu1 %v4030_v4  ;;  %v730_v4 = vunpack.c.0.s8 %v729_v14  ;;  %v732_v20 = vshrl.u32 %v731_v3, 7 }
  0x8f   : > { %3647 = vmatmul.mubr.f32.vlgmr.msra.gmra.mxu1 %v4170_v59 }
  0x90   : > { %v4231_v28 = vsub.s32 %v730_v4, %v732_v20  ;;  %v4236_v38 = vsub.s32 0, %v732_v20  ;;  %v4242_v44 = vsub.s32 %v893_v32, %v732_v20 }
 0x10c   : > { %v3487_v6 = vpop.f32.mrf.mxu0 }
 0x10d   : > { %v3494_v8 = vpop.f32.mrf.mxu1 }
 0x10e   : > { %v296_v7 = vpop.f32.mrf.mxu0  ;;  %v394_v9 = vadd.f32 %v3494_v8, %v3487_v6 }
 0x10f   : > { %v387_v10 = vpop.f32.mrf.mxu1 }
 0x110   : > { %v388_v11 = vadd.f32 %v387_v10, %v296_v7  ;;  %v3501_v12 = vpop.f32.mrf.mxu0 }
 0x111   : > { %v477_v15 = vadd.f32 %v3501_v12, %v394_v9 }
 0x112   : > { %v469_v16 = vpop.f32.mrf.mxu0 }
 0x113   : > { %v470_v17 = vadd.f32 %v469_v16, %v388_v11  ;;  %v3508_v18 = vpop.f32.mrf.mxu1 }
 0x114   : > { %v560_v19 = vadd.f32 %v3508_v18, %v477_v15 }
 0x115   : > { %v551_v21 = vpop.f32.mrf.mxu1 }
 0x116   : > { %v552_v22 = vadd.f32 %v551_v21, %v470_v17  ;;  %v3515_v23 = vpop.f32.mrf.mxu0 }
 0x117   : > { %v643_v24 = vadd.f32 %v3515_v23, %v560_v19 }
 0x118   : > { %v636_v27 = vpop.f32.mrf.mxu0 }
 0x119   : > { %v637_v29 = vadd.f32 %v636_v27, %v552_v22  ;;  %v3522_v30 = vpop.f32.mrf.mxu1 }
 0x11a   : > { %v722_v31 = vadd.f32 %v3522_v30, %v643_v24 }
 0x11b   : > { %v715_v33 = vpop.f32.mrf.mxu1 }
 0x11c   : > { %v776_v34 = vcombine.high %v722_v31, %v722_v31  ;;  %v783_v35 = vrot.slane %v722_v31, %v4231_v28  ;;  %v716_v36 = vadd.f32 %v715_v33, %v637_v29  ;;  %v4234_v37 = vpop.f32.mrf.mxu0 }
 0x11e   : > { %v790_v39 = vrot.slane %v776_v34, %v4231_v28  ;;  %v791_v40 = vcombine.high %v783_v35, %v783_v35  ;;  %v799_v41 = vrot.slane %v783_v35, %v4231_v28  ;;  %v727_v42 = vcombine.high %v716_v36, %v716_v36  ;;  %v4240_v43 = vpop.f32.mrf.mxu0 }
 0x11f   : > { %v734_v45 = vrot.slane %v716_v36, %v4231_v28  ;;  %v3536_v46 = vpop.f32.mrf.mxu1 }
 0x120   : > { %v792_v47 = vcombine.high %v790_v39, %v790_v39  ;;  %v806_v48 = vrot.slane %v790_v39, %v4231_v28  ;;  %v813_v49 = vrot.slane %v791_v40, %v4231_v28  ;;  %v821_v50 = vcombine.high %v799_v41, %v799_v41 }
 0x121   : > { %v860_v51 = vrot.slane %v799_v41, %v4236_v38  ;;  %v741_v52 = vrot.slane %v727_v42, %v4231_v28  ;;  %v742_v53 = vcombine.high %v734_v45, %v734_v45  ;;  %v750_v54 = vrot.slane %v734_v45, %v4231_v28  ;;  %v1139_v55 = vpop.f32.mrf.mxu1 }
 0x122   : > { %v820_v56 = vrot.slane %v792_v47, %v4231_v28  ;;  %v822_v57 = vcombine.high %v806_v48, %v806_v48  ;;  %v823_v58 = vcombine.high %v813_v49, %v813_v49  ;;  %v864_v59 = vrot.slane %v813_v49, %v4236_v38  ;;  %v3543_v60 = vpop.f32.mrf.mxu0 }
 0x123   : > { %v868_v61 = vrot.slane %v821_v50, %v4236_v38  ;;  %v876_v62 = vrot.slane %v806_v48, %v4236_v38  ;;  %v743_v63 = vcombine.high %v741_v52, %v741_v52  ;;  %v757_v0 = vrot.slane %v741_v52, %v4231_v28 }
 0x124   : > { %v824_v1 = vcombine.high %v820_v56, %v820_v56  ;;  %v872_v2 = vrot.slane %v823_v58, %v4236_v38  ;;  %v880_v5 = vrot.slane %v820_v56, %v4236_v38  ;;  %v884_v6 = vrot.slane %v822_v57, %v4236_v38  ;;  %v1221_v7 = vpop.f32.mrf.mxu0 }
 0x125   : > { %v923_v8 = vcombine.low %v860_v51, %v864_v59  ;;  %v764_v9 = vrot.slane %v742_v53, %v4231_v28  ;;  %v771_v10 = vrot.slane %v743_v63, %v4231_v28  ;;  %v772_v11 = vcombine.high %v750_v54, %v750_v54  ;;  %v3550_v12 = vpop.f32.mrf.mxu1 }
 0x126   : > { %v888_v13 = vrot.slane %v824_v1, %v4236_v38  ;;  %v924_v14 = vcombine.low %v868_v61, %v872_v2  ;;  %v940_v3 = vcombine.low %v876_v62, %v880_v5  ;;  %v773_v15 = vcombine.high %v757_v0, %v757_v0 }
 0x127   : > { %v931_v16 = vrot.slane %v923_v8, %v4242_v44  ;;  %v774_v17 = vcombine.high %v764_v9, %v764_v9  ;;  %v775_v18 = vcombine.high %v771_v10, %v771_v10  ;;  %v828_v19 = vrot.slane %v750_v54, %v4236_v38  ;;  %v1303_v4 = vpop.f32.mrf.mxu1 }
 0x128   : > { %v938_v20 = vrot.slane %v924_v14, %v4242_v44  ;;  %v941_v21 = vcombine.low %v884_v6, %v888_v13  ;;  %v948_v22 = vrot.slane %v940_v3, %v4242_v44  ;;  %v832_v23 = vrot.slane %v764_v9, %v4236_v38  ;;  %v3557_v24 = vpop.f32.mrf.mxu0 }
 0x129   : > { %v836_v25 = vrot.slane %v772_v11, %v4236_v38  ;;  %v840_v26 = vrot.slane %v774_v17, %v4236_v38  ;;  %v844_v27 = vrot.slane %v757_v0, %v4236_v38  ;;  %v848_v29 = vrot.slane %v771_v10, %v4236_v38 }
 0x12a   : > { %v939_v30 = vcombine.low %v931_v16, %v938_v20  ;;  %v955_v31 = vrot.slane %v941_v21, %v4242_v44  ;;  %v852_v32 = vrot.slane %v773_v15, %v4236_v38  ;;  %v856_v33 = vrot.slane %v775_v18, %v4236_v38  ;;  %v1388_v34 = vpop.f32.mrf.mxu0 }
 0x12b   : > { %v889_v35 = vcombine.low %v828_v19, %v832_v23  ;;  %v890_v36 = vcombine.low %v836_v25, %v840_v26  ;;  %v906_v39 = vcombine.low %v844_v27, %v848_v29  ;;  %v1146_v40 = vadd.f32 %v3536_v46, %v4234_v37  ;;  %v3564_v41 = vpop.f32.mrf.mxu1 }
 0x12c   : > { %v956_v42 = vcombine.low %v948_v22, %v955_v31  ;;  %964 = vst.msk [vmem:[%s4275_s19 + $0x10] sm:$0xff] %vm961_vm1, %v939_v30  ;;  %v907_v45 = vcombine.low %v852_v32, %v856_v33  ;;  %v1140_v47 = vadd.f32 %v1139_v55, %v4240_v43 }
 0x12d   : > { %v897_v48 = vrot.slane %v889_v35, %v4242_v44  ;;  %v904_v49 = vrot.slane %v890_v36, %v4242_v44  ;;  %v1229_v50 = vadd.f32 %v3543_v60, %v1146_v40  ;;  %v1467_v51 = vpop.f32.mrf.mxu1  ;;  %v914_v37 = vrot.slane %v906_v39, %v4242_v44 }
 0x12e   : > { %965 = vst.msk [vmem:[%s4275_s19 + $0x18] sm:$0xff] %vm961_vm1, %v956_v42  ;;  %v921_v46 = vrot.slane %v907_v45, %v4242_v44  ;;  %v1222_v52 = vadd.f32 %v1221_v7, %v1140_v47  ;;  %v3571_v53 = vpop.f32.mrf.mxu0 }
 0x12f   : > { %v905_v54 = vcombine.low %v897_v48, %v904_v49  ;;  %v1312_v56 = vadd.f32 %v3550_v12, %v1229_v50 }
 0x130   : > { %v922_v57 = vcombine.low %v914_v37, %v921_v46  ;;  %v1304_v58 = vadd.f32 %v1303_v4, %v1222_v52  ;;  %v1800_v43 = vpop.f32.mrf.mxu0 }
 0x131   : > { %962 = vst.msk [vmem:[%s4275_s19] sm:$0xff] %vm961_vm1, %v905_v54  ;;  %v1395_v55 = vadd.f32 %v3557_v24, %v1312_v56  ;;  %v3578_v59 = vpop.f32.mrf.mxu1 }
 0x132   : > { %963 = vst.msk [vmem:[%s4275_s19 + $0x8] sm:$0xff] %vm961_vm1, %v922_v57  ;;  %v1389_v60 = vadd.f32 %v1388_v34, %v1304_v58  ;;  %v1898_v61 = vadd.f32 %v3578_v59, %v3571_v53 }
 0x133   : > { %v1474_v62 = vadd.f32 %v3564_v41, %v1395_v55  ;;  %v1891_v63 = vpop.f32.mrf.mxu1 }
 0x134   : > { %v1468_v0 = vadd.f32 %v1467_v51, %v1389_v60  ;;  %v1892_v1 = vadd.f32 %v1891_v63, %v1800_v43  ;;  %v3585_v2 = vpop.f32.mrf.mxu0 }
 0x135   : > { %v1528_v5 = vcombine.high %v1474_v62, %v1474_v62  ;;  %v1535_v6 = vrot.slane %v1474_v62, %v4231_v28  ;;  %v1981_v7 = vadd.f32 %v3585_v2, %v1898_v61 }
 0x136   : > { %v1479_v8 = vcombine.high %v1468_v0, %v1468_v0  ;;  %v1486_v9 = vrot.slane %v1468_v0, %v4231_v28  ;;  %v1973_v10 = vpop.f32.mrf.mxu0 }
 0x137   : > { %v1542_v11 = vrot.slane %v1528_v5, %v4231_v28  ;;  %v1543_v12 = vcombine.high %v1535_v6, %v1535_v6  ;;  %v1551_v13 = vrot.slane %v1535_v6, %v4231_v28  ;;  %v1974_v14 = vadd.f32 %v1973_v10, %v1892_v1  ;;  %v3592_v3 = vpop.f32.mrf.mxu1 }
 0x138   : > { %v1493_v15 = vrot.slane %v1479_v8, %v4231_v28  ;;  %v1494_v16 = vcombine.high %v1486_v9, %v1486_v9  ;;  %v1502_v17 = vrot.slane %v1486_v9, %v4231_v28  ;;  %v2064_v18 = vadd.f32 %v3592_v3, %v1981_v7 }
 0x139   : > { %v1544_v19 = vcombine.high %v1542_v11, %v1542_v11  ;;  %v1558_v4 = vrot.slane %v1542_v11, %v4231_v28  ;;  %v1565_v20 = vrot.slane %v1543_v12, %v4231_v28  ;;  %v1573_v21 = vcombine.high %v1551_v13, %v1551_v13  ;;  %v2055_v22 = vpop.f32.mrf.mxu1 }
 0x13a   : > { %v1612_v23 = vrot.slane %v1551_v13, %v4236_v38  ;;  %v1495_v24 = vcombine.high %v1493_v15, %v1493_v15  ;;  %v1509_v25 = vrot.slane %v1493_v15, %v4231_v28  ;;  %v1516_v26 = vrot.slane %v1494_v16, %v4231_v28  ;;  %v3599_v27 = vpop.f32.mrf.mxu0 }
 0x13b   : > { %v1572_v29 = vrot.slane %v1544_v19, %v4231_v28  ;;  %v1574_v30 = vcombine.high %v1558_v4, %v1558_v4  ;;  %v1575_v31 = vcombine.high %v1565_v20, %v1565_v20  ;;  %v1616_v32 = vrot.slane %v1565_v20, %v4236_v38 }
 0x13c   : > { %v1620_v33 = vrot.slane %v1573_v21, %v4236_v38  ;;  %v1628_v34 = vrot.slane %v1558_v4, %v4236_v38  ;;  %v1523_v35 = vrot.slane %v1495_v24, %v4231_v28  ;;  %v1524_v36 = vcombine.high %v1502_v17, %v1502_v17  ;;  %v2140_v39 = vpop.f32.mrf.mxu0 }
 0x13d   : > { %v1576_v40 = vcombine.high %v1572_v29, %v1572_v29  ;;  %v1624_v41 = vrot.slane %v1575_v31, %v4236_v38  ;;  %v1632_v42 = vrot.slane %v1572_v29, %v4236_v38  ;;  %v1636_v45 = vrot.slane %v1574_v30, %v4236_v38  ;;  %v3606_v47 = vpop.f32.mrf.mxu1 }
 0x13e   : > { %v1675_v48 = vcombine.low %v1612_v23, %v1616_v32  ;;  %v1525_v49 = vcombine.high %v1509_v25, %v1509_v25  ;;  %v1526_v50 = vcombine.high %v1516_v26, %v1516_v26  ;;  %v1527_v51 = vcombine.high %v1523_v35, %v1523_v35 }
 0x13f   : > { %v1640_v37 = vrot.slane %v1576_v40, %v4236_v38  ;;  %v1676_v46 = vcombine.low %v1620_v33, %v1624_v41  ;;  %v1692_v52 = vcombine.low %v1628_v34, %v1632_v42  ;;  %v1580_v53 = vrot.slane %v1502_v17, %v4236_v38  ;;  %v2219_v54 = vpop.f32.mrf.mxu1 }
 0x140   : > { %v1683_v56 = vrot.slane %v1675_v48, %v4242_v44  ;;  %v1584_v57 = vrot.slane %v1516_v26, %v4236_v38  ;;  %v1588_v58 = vrot.slane %v1524_v36, %v4236_v38  ;;  %v1592_v43 = vrot.slane %v1526_v50, %v4236_v38  ;;  %v3613_v55 = vpop.f32.mrf.mxu0 }
 0x141   : > { %v1690_v59 = vrot.slane %v1676_v46, %v4242_v44  ;;  %v1693_v60 = vcombine.low %v1636_v45, %v1640_v37  ;;  %v1700_v61 = vrot.slane %v1692_v52, %v4242_v44  ;;  %v1596_v62 = vrot.slane %v1509_v25, %v4236_v38 }
 0x142   : > { %v1600_v63 = vrot.slane %v1523_v35, %v4236_v38  ;;  %v1604_v0 = vrot.slane %v1525_v49, %v4236_v38  ;;  %v1608_v1 = vrot.slane %v1527_v51, %v4236_v38  ;;  %v1641_v2 = vcombine.low %v1580_v53, %v1584_v57  ;;  %v2552_v5 = vpop.f32.mrf.mxu0 }
 0x143   : > { %v1691_v6 = vcombine.low %v1683_v56, %v1690_v59  ;;  %v1707_v7 = vrot.slane %v1693_v60, %v4242_v44  ;;  %v1642_v8 = vcombine.low %v1588_v58, %v1592_v43  ;;  %v2056_v9 = vadd.f32 %v2055_v22, %v1974_v14  ;;  %v3620_v10 = vpop.f32.mrf.mxu1 }
 0x144   : > { %v1649_v11 = vrot.slane %v1641_v2, %v4242_v44  ;;  %v1658_v12 = vcombine.low %v1596_v62, %v1600_v63  ;;  %v1659_v13 = vcombine.low %v1604_v0, %v1608_v1  ;;  %v2147_v3 = vadd.f32 %v3599_v27, %v2064_v18 }
 0x145   : > { %v1708_v15 = vcombine.low %v1700_v61, %v1707_v7  ;;  %3361 = vst.msk [vmem:[%s4275_s19 + $0x30] sm:$0xff] %vm961_vm1, %v1691_v6  ;;  %v1656_v16 = vrot.slane %v1642_v8, %v4242_v44  ;;  %v2141_v17 = vadd.f32 %v2140_v39, %v2056_v9  ;;  %v2650_v19 = vadd.f32 %v3620_v10, %v3613_v55  ;;  %v2643_v4 = vpop.f32.mrf.mxu1 }
 0x146   : > { %v1666_v20 = vrot.slane %v1658_v12, %v4242_v44  ;;  %v1673_v14 = vrot.slane %v1659_v13, %v4242_v44  ;;  %v2226_v21 = vadd.f32 %v3606_v47, %v2147_v3  ;;  %v2644_v22 = vadd.f32 %v2643_v4, %v2552_v5  ;;  %v3627_v23 = vpop.f32.mrf.mxu0 }
 0x147   : > { %3362 = vst.msk [vmem:[%s4275_s19 + $0x38] sm:$0xff] %vm961_vm1, %v1708_v15  ;;  %v1657_v18 = vcombine.low %v1649_v11, %v1656_v16  ;;  %v2220_v24 = vadd.f32 %v2219_v54, %v2141_v17  ;;  %v2733_v25 = vadd.f32 %v3627_v23, %v2650_v19 }
 0x148   : > { %v1674_v26 = vcombine.low %v1666_v20, %v1673_v14  ;;  %v2280_v27 = vcombine.high %v2226_v21, %v2226_v21  ;;  %v2287_v29 = vrot.slane %v2226_v21, %v4231_v28  ;;  %v2725_v30 = vpop.f32.mrf.mxu0 }
 0x149   : > { %3359 = vst.msk [vmem:[%s4275_s19 + $0x20] sm:$0xff] %vm961_vm1, %v1657_v18  ;;  %v2231_v31 = vcombine.high %v2220_v24, %v2220_v24  ;;  %v2238_v32 = vrot.slane %v2220_v24, %v4231_v28  ;;  %v3634_v33 = vpop.f32.mrf.mxu1  ;;  %v2726_v39 = vadd.f32 %v2725_v30, %v2644_v22 }
 0x14a   : > { %3360 = vst.msk [vmem:[%s4275_s19 + $0x28] sm:$0xff] %vm961_vm1, %v1674_v26  ;;  %v2294_v34 = vrot.slane %v2280_v27, %v4231_v28  ;;  %v2295_v35 = vcombine.high %v2287_v29, %v2287_v29  ;;  %v2303_v36 = vrot.slane %v2287_v29, %v4231_v28  ;;  %v2816_v45 = vadd.f32 %v3634_v33, %v2733_v25 }
 0x14b   : > { %v2245_v40 = vrot.slane %v2231_v31, %v4231_v28  ;;  %v2246_v41 = vcombine.high %v2238_v32, %v2238_v32  ;;  %v2254_v42 = vrot.slane %v2238_v32, %v4231_v28  ;;  %v2807_v60 = vpop.f32.mrf.mxu1 }
 0x14c   : > { %v2296_v47 = vcombine.high %v2294_v34, %v2294_v34  ;;  %v2310_v48 = vrot.slane %v2294_v34, %v4231_v28  ;;  %v2317_v49 = vrot.slane %v2295_v35, %v4231_v28  ;;  %v2325_v50 = vcombine.high %v2303_v36, %v2303_v36  ;;  %v3641_v7 = vpop.f32.mrf.mxu0 }
 0x14d   : > { %v2364_v51 = vrot.slane %v2303_v36, %v4236_v38  ;;  %v2247_v37 = vcombine.high %v2245_v40, %v2245_v40  ;;  %v2261_v46 = vrot.slane %v2245_v40, %v4231_v28  ;;  %v2268_v52 = vrot.slane %v2246_v41, %v4231_v28 }
 0x14e   : > { %v2324_v53 = vrot.slane %v2296_v47, %v4231_v28  ;;  %v2326_v54 = vcombine.high %v2310_v48, %v2310_v48  ;;  %v2327_v56 = vcombine.high %v2317_v49, %v2317_v49  ;;  %v2368_v57 = vrot.slane %v2317_v49, %v4236_v38  ;;  %v2892_v18 = vpop.f32.mrf.mxu0 }
 0x14f   : > { %v2372_v58 = vrot.slane %v2325_v50, %v4236_v38  ;;  %v2380_v43 = vrot.slane %v2310_v48, %v4236_v38  ;;  %v2275_v55 = vrot.slane %v2247_v37, %v4231_v28  ;;  %v2276_v59 = vcombine.high %v2254_v42, %v2254_v42  ;;  %v3648_v16 = vpop.f32.mrf.mxu1 }
 0x150   : > { %v2328_v61 = vcombine.high %v2324_v53, %v2324_v53  ;;  %v2376_v62 = vrot.slane %v2327_v56, %v4236_v38  ;;  %v2384_v63 = vrot.slane %v2324_v53, %v4236_v38  ;;  %v2388_v0 = vrot.slane %v2326_v54, %v4236_v38 }
 0x151   : > { %v2427_v1 = vcombine.low %v2364_v51, %v2368_v57  ;;  %v2277_v2 = vcombine.high %v2261_v46, %v2261_v46  ;;  %v2278_v5 = vcombine.high %v2268_v52, %v2268_v52  ;;  %v2279_v6 = vcombine.high %v2275_v55, %v2275_v55  ;;  %v2971_v32 = vpop.f32.mrf.mxu1 }
 0x152   : > { %v2392_v8 = vrot.slane %v2328_v61, %v4236_v38  ;;  %v2428_v9 = vcombine.low %v2372_v58, %v2376_v62  ;;  %v2444_v10 = vcombine.low %v2380_v43, %v2384_v63  ;;  %v2332_v11 = vrot.slane %v2254_v42, %v4236_v38 }
 0x153   : > { %v2435_v12 = vrot.slane %v2427_v1, %v4242_v44  ;;  %v2336_v13 = vrot.slane %v2268_v52, %v4236_v38  ;;  %v2340_v3 = vrot.slane %v2276_v59, %v4236_v38  ;;  %v2344_v15 = vrot.slane %v2278_v5, %v4236_v38 }
 0x154   : > { %v2442_v17 = vrot.slane %v2428_v9, %v4242_v44  ;;  %v2445_v19 = vcombine.low %v2388_v0, %v2392_v8  ;;  %v2452_v4 = vrot.slane %v2444_v10, %v4242_v44  ;;  %v2348_v20 = vrot.slane %v2261_v46, %v4236_v38 }
 0x155   : > { %v2352_v14 = vrot.slane %v2275_v55, %v4236_v38  ;;  %v2356_v21 = vrot.slane %v2277_v2, %v4236_v38  ;;  %v2360_v22 = vrot.slane %v2279_v6, %v4236_v38  ;;  %v2393_v23 = vcombine.low %v2332_v11, %v2336_v13 }
 0x156   : > { %v2443_v24 = vcombine.low %v2435_v12, %v2442_v17  ;;  %v2459_v25 = vrot.slane %v2445_v19, %v4242_v44  ;;  %v2394_v26 = vcombine.low %v2340_v3, %v2344_v15  ;;  %v2808_v27 = vadd.f32 %v2807_v60, %v2726_v39 }
 0x157   : > { %v2410_v29 = vcombine.low %v2348_v20, %v2352_v14  ;;  %v2411_v30 = vcombine.low %v2356_v21, %v2360_v22  ;;  %v2899_v31 = vadd.f32 %v3641_v7, %v2816_v45  ;;  %v2401_v34 = vrot.slane %v2393_v23, %v4242_v44 }
 0x158   : > { %v2460_v33 = vcombine.low %v2452_v4, %v2459_v25  ;;  %3367 = vst.msk [vmem:[%s4275_s19 + $0x50] sm:$0xff] %vm961_vm1, %v2443_v24  ;;  %v2408_v35 = vrot.slane %v2394_v26, %v4242_v44  ;;  %v2893_v36 = vadd.f32 %v2892_v18, %v2808_v27 }
 0x159   : > { %v2418_v40 = vrot.slane %v2410_v29, %v4242_v44  ;;  %v2425_v41 = vrot.slane %v2411_v30, %v4242_v44  ;;  %v2978_v42 = vadd.f32 %v3648_v16, %v2899_v31 }
 0x15a   : > { %3368 = vst.msk [vmem:[%s4275_s19 + $0x58] sm:$0xff] %vm961_vm1, %v2460_v33  ;;  %v2409_v39 = vcombine.low %v2401_v34, %v2408_v35  ;;  %v2972_v45 = vadd.f32 %v2971_v32, %v2893_v36 }
 0x15b   : > { %v2426_v47 = vcombine.low %v2418_v40, %v2425_v41  ;;  %v3032_v48 = vcombine.high %v2978_v42, %v2978_v42  ;;  %v3039_v49 = vrot.slane %v2978_v42, %v4231_v28 }
 0x15c   : > { %3365 = vst.msk [vmem:[%s4275_s19 + $0x40] sm:$0xff] %vm961_vm1, %v2409_v39  ;;  %v2983_v50 = vcombine.high %v2972_v45, %v2972_v45  ;;  %v2990_v51 = vrot.slane %v2972_v45, %v4231_v28 }
 0x15d   : > { %3366 = vst.msk [vmem:[%s4275_s19 + $0x48] sm:$0xff] %vm961_vm1, %v2426_v47  ;;  %v3046_v37 = vrot.slane %v3032_v48, %v4231_v28  ;;  %v3047_v46 = vcombine.high %v3039_v49, %v3039_v49  ;;  %v3055_v52 = vrot.slane %v3039_v49, %v4231_v28 }
 0x15e   : > { %v2997_v53 = vrot.slane %v2983_v50, %v4231_v28  ;;  %v2998_v54 = vcombine.high %v2990_v51, %v2990_v51  ;;  %v3006_v56 = vrot.slane %v2990_v51, %v4231_v28 }
 0x15f   : > { %v3048_v57 = vcombine.high %v3046_v37, %v3046_v37  ;;  %v3062_v58 = vrot.slane %v3046_v37, %v4231_v28  ;;  %v3069_v43 = vrot.slane %v3047_v46, %v4231_v28  ;;  %v3077_v55 = vcombine.high %v3055_v52, %v3055_v52 }
 0x160   : > { %v2999_v59 = vcombine.high %v2997_v53, %v2997_v53  ;;  %v3013_v60 = vrot.slane %v2997_v53, %v4231_v28  ;;  %v3020_v61 = vrot.slane %v2998_v54, %v4231_v28  ;;  %v3116_v2 = vrot.slane %v3055_v52, %v4236_v38 }
 0x161   : > { %v3076_v62 = vrot.slane %v3048_v57, %v4231_v28  ;;  %v3078_v63 = vcombine.high %v3062_v58, %v3062_v58  ;;  %v3079_v0 = vcombine.high %v3069_v43, %v3069_v43  ;;  %v3120_v1 = vrot.slane %v3069_v43, %v4236_v38 }
 0x162   : > { %v3124_v5 = vrot.slane %v3077_v55, %v4236_v38  ;;  %v3132_v6 = vrot.slane %v3062_v58, %v4236_v38  ;;  %v3027_v7 = vrot.slane %v2999_v59, %v4231_v28  ;;  %v3028_v11 = vcombine.high %v3006_v56, %v3006_v56 }
 0x163   : > { %v3080_v8 = vcombine.high %v3076_v62, %v3076_v62  ;;  %v3128_v9 = vrot.slane %v3079_v0, %v4236_v38  ;;  %v3136_v10 = vrot.slane %v3076_v62, %v4236_v38  ;;  %v3179_v12 = vcombine.low %v3116_v2, %v3120_v1 }
 0x164   : > { %v3029_v13 = vcombine.high %v3013_v60, %v3013_v60  ;;  %v3030_v3 = vcombine.high %v3020_v61, %v3020_v61  ;;  %v3031_v15 = vcombine.high %v3027_v7, %v3027_v7  ;;  %v3140_v16 = vrot.slane %v3078_v63, %v4236_v38 }
 0x165   : > { %v3144_v17 = vrot.slane %v3080_v8, %v4236_v38  ;;  %v3180_v19 = vcombine.low %v3124_v5, %v3128_v9  ;;  %v3196_v4 = vcombine.low %v3132_v6, %v3136_v10  ;;  %v3187_v20 = vrot.slane %v3179_v12, %v4242_v44 }
 0x166   : > { %v3084_v28 = vrot.slane %v3006_v56, %v4236_v38  ;;  %v3088_v14 = vrot.slane %v3020_v61, %v4236_v38  ;;  %v3096_v21 = vrot.slane %v3030_v3, %v4236_v38  ;;  %v3092_v18 = vrot.slane %v3028_v11, %v4236_v38 }
 0x167   : > { %v3194_v22 = vrot.slane %v3180_v19, %v4242_v44  ;;  %v3197_v23 = vcombine.low %v3140_v16, %v3144_v17  ;;  %v3100_v24 = vrot.slane %v3013_v60, %v4236_v38  ;;  %v3104_v25 = vrot.slane %v3027_v7, %v4236_v38 }
 0x168   : > { %v3108_v26 = vrot.slane %v3029_v13, %v4236_v38  ;;  %v3112_v27 = vrot.slane %v3031_v15, %v4236_v38  ;;  %v3145_v29 = vcombine.low %v3084_v28, %v3088_v14  ;;  %v3204_v31 = vrot.slane %v3196_v4, %v4242_v44 }
 0x169   : > { %v3195_v30 = vcombine.low %v3187_v20, %v3194_v22  ;;  %v3211_v32 = vrot.slane %v3197_v23, %v4242_v44  ;;  %v3146_v33 = vcombine.low %v3092_v18, %v3096_v21  ;;  %v3162_v34 = vcombine.low %v3100_v24, %v3104_v25 }
 0x16a   : > { %v3163_v35 = vcombine.low %v3108_v26, %v3112_v27  ;;  %v3153_v38 = vrot.slane %v3145_v29, %v4242_v44 }
 0x16b   : > { %v3212_v36 = vcombine.low %v3204_v31, %v3211_v32  ;;  %3373 = vst.msk [vmem:[%s4275_s19 + $0x70] sm:$0xff] %vm961_vm1, %v3195_v30  ;;  %v3160_v40 = vrot.slane %v3146_v33, %v4242_v44  ;;  %v3170_v41 = vrot.slane %v3162_v34, %v4242_v44 }
 0x16c   : > { %v3177_v42 = vrot.slane %v3163_v35, %v4242_v44 }
 0x16d   : > { %3374 = vst.msk [vmem:[%s4275_s19 + $0x78] sm:$0xff] %vm961_vm1, %v3212_v36  ;;  %v3161_v39 = vcombine.low %v3153_v38, %v3160_v40 }
 0x16e   : > { %v3178_v45 = vcombine.low %v3170_v41, %v3177_v42 }
 0x16f   : > { %3371 = vst.msk [vmem:[%s4275_s19 + $0x60] sm:$0xff] %vm961_vm1, %v3161_v39 }
 0x170   : > { %3372 = vst.msk [vmem:[%s4275_s19 + $0x68] sm:$0xff] %vm961_vm1, %v3178_v45 }
 0x171   : > { %3795 = shalt.err (!%p3792_p5)
}
 0x172   : > { %s3796_s3 = scalar_lea.hbm %s4423_s12, 2048  ;;  %s3800_s7 = scalar_lea.hbm %s4479_s2, 4096 }
 0x173   : > { %p3797_p7 = scmp.ne.s32.totalorder %s4423_s12, %s3796_s3  ;;  %p3801_p9 = scmp.lt.s32.totalorder %s4423_s12, %s4479_s2 }
 0x174   : > { %p3802_p11 = scmp.lt.s32.totalorder %s3800_s7, %s3796_s3 }
 0x175   : > { %p3798_p4 = pnand %p3797_p7, %p3982_p13 }
 0x176   : > { %p3803_p10 = por %p3802_p11, %p3801_p9 }
 0x177   : > { %p3799_p6 = pneg %p3798_p4 }
 0x179   : > { %p3804_p1 = pnand %p3803_p10, %p3799_p6 }
 0x17b   : > { %3807 = shalt.err (!%p3804_p1)
}
 0x17c   : > { %s3875_s17 = smov 128   ;;  %s3876_s19 = smov 8  }
 0x17d   : > { %3655 = dma.vmem_to_hbm [thread:$0]  (%p3982_p13), %s4425_s28, 2048, %s4423_s12, %s3223_s26, %s3875_s17, %s3875_s17, %s3876_s19  }
 0x17e PF: > { %s3255_s21 = sand.u32 1, %s3846_s9   ;;  %p4493_p8 = scmp.ne.s32.totalorder %s4485_s20, 0 }
 0x17f   : > { %p4494_p12 = scmp.ge.s32.totalorder %s3866_s14, 2  ;;  %s3256_s23 = scalar_lea.sflag [#allocation4], %s3255_s21 }
 0x181   : > { %p3666_p0 = pnand %p4494_p12, %p4493_p8 }
 0x183   : > { %p3667_p2 = pneg %p3666_p0 }
 0x185   : > { %3841 = dma.done.wait (%p3667_p2), %s3256_s23, 2048  }
 0x186   : > { %3843 = vsyncadd (%p3667_p2), %s3256_s23, 4294965248  ;;  %s19_s14 = sadd.s32 1, %s3866_s14   ;;  %s4495_s9 = smov %s3850_s10 }
 0x187   : > { %p16_p3 = scmp.ge.s32.totalorder %s19_s14, 4   ;;  %s4496_s10 = smov %s3854_s11 }
 0x188   : > { %s4497_s11 = smov %s3991_s15  ;;  %s4498_s12 = smov %s3862_s13 }
 0x189   : > { %s4499_s13 = smov %s4501_s25  ;;  %18 = sbr.rel (!%p16_p3) target bundleno = 7 (0x7), region = 84 }
 0x18e   :  { %3261 = vsyncpa [#allocation3], 1 }
 0x18f   :  { %3263 = vsyncpa [#allocation3 + $0x1], 1 }
 0x190   :  { %3264 = vsyncpa [#allocation6], 1 }
 0x191   :  { %3266 = vsyncpa [#allocation6 + $0x1], 1 }
 0x192   :  { %3267 = vsyncpa [#allocation4], 1 }
 0x193   :  { %3269 = vsyncpa [#allocation4 + $0x1], 1 }

</bundles_post_ra>
